<compile_context>
chip_gen: v7x
topology: tpu7x:2x2x1
jax: 0.10.0
libtpu: 0.0.40
codegen_flags: <defaults>
</compile_context>

<pallas_src>
import functools

import jax
import jax.numpy as jnp
from jax.experimental import pallas as pl
from jax.experimental.pallas import tpu as pltpu


def linear_lane_kernel(w_ref, b_ref, xt_ref, o_ref):
    """VPU linear layer over a lane-major tile.

    w_ref : (K,)        f32 SMEM   -- weight scalars
    b_ref : (1,)        f32 SMEM   -- bias scalar
    xt_ref: (K, N_TILE) f32 VMEM   -- inputs, batch along lanes
    o_ref : (1, N_TILE) f32 VMEM   -- outputs, batch along lanes
    """
    k = xt_ref.shape[0]
    # Unrolled multiply-add over the (tiny, static) K dimension: pure VPU work.
    acc = xt_ref[0:1, :] * w_ref[0]
    for j in range(1, k):
        acc = acc + xt_ref[j:j + 1, :] * w_ref[j]
    o_ref[...] = (acc + b_ref[0]).astype(o_ref.dtype)


def prepare_params(weight, bias):
    """One-time parameter prep (PyTorch layout (1, K) / (1,) -> kernel layout)."""
    out_features, k = weight.shape
    assert out_features == 1, "kernel is specialized for Linear(K, 1)"
    w_vec = weight.reshape(k).astype(jnp.float32)           # (K,)
    b_vec = bias.reshape(out_features).astype(jnp.float32)  # (1,)
    return w_vec, b_vec


@functools.partial(jax.jit, static_argnames=("n_tile",))
def linear_forward(x, w_vec, b_vec, *, n_tile=2048):
    """x: (N, K) f32, w_vec: (K,) f32, b_vec: (1,) f32 -> (N, 1) f32."""
    n, k = x.shape
    out_features = b_vec.shape[0]

    # Lane-major layout: features on the sublane axis, batch on the lane axis.
    xt = x.astype(jnp.float32).T                      # (K, N)
    num_tiles = pl.cdiv(n, n_tile)
    n_pad = num_tiles * n_tile
    if n_pad != n:
        xt = jnp.pad(xt, ((0, 0), (0, n_pad - n)))    # (K, N_pad)

    out = pl.pallas_call(
        linear_lane_kernel,
        out_shape=jax.ShapeDtypeStruct((out_features, n_pad), jnp.float32),
        grid_spec=pltpu.PrefetchScalarGridSpec(
            num_scalar_prefetch=0,
            grid=(num_tiles,),
            in_specs=[
                # Scalars live in SMEM; whole (tiny) arrays, no tiling.
                pl.BlockSpec(memory_space=pltpu.MemorySpace.SMEM),  # weight (K,)
                pl.BlockSpec(memory_space=pltpu.MemorySpace.SMEM),  # bias   (1,)
                # Streaming input: (K, N_TILE) lane-dense tiles.
                pl.BlockSpec((k, n_tile), lambda i: (0, i)),
            ],
            out_specs=pl.BlockSpec((out_features, n_tile), lambda i: (0, i)),
        ),
        compiler_params=pltpu.CompilerParams(
            dimension_semantics=("parallel",),
        ),
    )(w_vec, b_vec, xt)

    # Back to PyTorch layout: (1, N_pad) -> (N, 1).
    return out[:, :n].T


if __name__ == "__main__":
    key = jax.random.PRNGKey(0)
    kx, kw, kb, kx2 = jax.random.split(key, 4)

    in_features, out_features = 5, 1

    # Deterministic parameter init mimicking nn.Linear's default
    # uniform(-1/sqrt(in_features), 1/sqrt(in_features)).
    bound = 1.0 / jnp.sqrt(jnp.float32(in_features))
    weight = jax.random.uniform(
        kw, (out_features, in_features), dtype=jnp.float32,
        minval=-bound, maxval=bound)
    bias = jax.random.uniform(
        kb, (out_features,), dtype=jnp.float32, minval=-bound, maxval=bound)

    # One-time parameter prep (done once, not per forward call).
    w_vec, b_vec = prepare_params(weight, bias)

    # Small batch (forward implies last dim == 5 for Linear(5, 1)).
    n_small = 8
    x_small = jax.random.normal(kx, (n_small, in_features), dtype=jnp.float32)
    out_small = jax.block_until_ready(linear_forward(x_small, w_vec, b_vec))
    ref_small = x_small @ weight.T + bias
    assert out_small.shape == (n_small, out_features)
    assert jnp.allclose(out_small, ref_small, atol=1e-5, rtol=1e-5)

    # Second check exercising multiple grid tiles + lane padding.
    n_big = 1000
    x_big = jax.random.normal(kx2, (n_big, in_features), dtype=jnp.float32)
    out_big = jax.block_until_ready(
        linear_forward(x_big, w_vec, b_vec, n_tile=512))
    ref_big = x_big @ weight.T + bias
    assert out_big.shape == (n_big, out_features)
    assert jnp.allclose(out_big, ref_big, atol=1e-5, rtol=1e-5)

    print("KERNEL_OK")
</pallas_src>

<mosaic_0001>
module attributes {stable_mosaic.version = 11 : i64} {
  func.func @linear_lane_kernel(%arg0: i32, %arg1: memref<5xf32, #tpu.memory_space<smem>>, %arg2: memref<1xf32, #tpu.memory_space<smem>>, %arg3: memref<5x2048xf32, #tpu.memory_space<vmem>>, %arg4: memref<1x2048xf32, #tpu.memory_space<vmem>>) attributes {dimension_semantics = [#tpu.dimension_semantics<parallel>], iteration_bounds = array<i64: 1>, scalar_prefetch = 0 : i64, scratch_operands = 0 : i64, tpu.core_type = #tpu.core_type<tc>, window_params = [{transform_indices = @transform_0, window_bounds = array<i64: 5>}, {transform_indices = @transform_1, window_bounds = array<i64: 1>}, {transform_indices = @transform_2, window_bounds = array<i64: 5, 2048>}, {transform_indices = @transform_3, window_bounds = array<i64: 1, 2048>}]} {
    %c0 = arith.constant 0 : index
    %c0_0 = arith.constant 0 : index
    %0 = vector.load %arg3[%c0, %c0_0] : memref<5x2048xf32, #tpu.memory_space<vmem>>, vector<1x2048xf32>
    %c0_1 = arith.constant 0 : index
    %1 = memref.load %arg1[%c0_1] : memref<5xf32, #tpu.memory_space<smem>>
    %2 = vector.broadcast %1 : f32 to vector<1x2048xf32>
    %3 = arith.mulf %0, %2 : vector<1x2048xf32>
    %c1 = arith.constant 1 : index
    %c0_2 = arith.constant 0 : index
    %4 = vector.load %arg3[%c1, %c0_2] : memref<5x2048xf32, #tpu.memory_space<vmem>>, vector<1x2048xf32>
    %c1_3 = arith.constant 1 : index
    %5 = memref.load %arg1[%c1_3] : memref<5xf32, #tpu.memory_space<smem>>
    %6 = vector.broadcast %5 : f32 to vector<1x2048xf32>
    %7 = arith.mulf %4, %6 : vector<1x2048xf32>
    %8 = arith.addf %3, %7 : vector<1x2048xf32>
    %c2 = arith.constant 2 : index
    %c0_4 = arith.constant 0 : index
    %9 = vector.load %arg3[%c2, %c0_4] : memref<5x2048xf32, #tpu.memory_space<vmem>>, vector<1x2048xf32>
    %c2_5 = arith.constant 2 : index
    %10 = memref.load %arg1[%c2_5] : memref<5xf32, #tpu.memory_space<smem>>
    %11 = vector.broadcast %10 : f32 to vector<1x2048xf32>
    %12 = arith.mulf %9, %11 : vector<1x2048xf32>
    %13 = arith.addf %8, %12 : vector<1x2048xf32>
    %c3 = arith.constant 3 : index
    %c0_6 = arith.constant 0 : index
    %14 = vector.load %arg3[%c3, %c0_6] : memref<5x2048xf32, #tpu.memory_space<vmem>>, vector<1x2048xf32>
    %c3_7 = arith.constant 3 : index
    %15 = memref.load %arg1[%c3_7] : memref<5xf32, #tpu.memory_space<smem>>
    %16 = vector.broadcast %15 : f32 to vector<1x2048xf32>
    %17 = arith.mulf %14, %16 : vector<1x2048xf32>
    %18 = arith.addf %13, %17 : vector<1x2048xf32>
    %c4 = arith.constant 4 : index
    %c0_8 = arith.constant 0 : index
    %19 = vector.load %arg3[%c4, %c0_8] : memref<5x2048xf32, #tpu.memory_space<vmem>>, vector<1x2048xf32>
    %c4_9 = arith.constant 4 : index
    %20 = memref.load %arg1[%c4_9] : memref<5xf32, #tpu.memory_space<smem>>
    %21 = vector.broadcast %20 : f32 to vector<1x2048xf32>
    %22 = arith.mulf %19, %21 : vector<1x2048xf32>
    %23 = arith.addf %18, %22 : vector<1x2048xf32>
    %c0_10 = arith.constant 0 : index
    %24 = memref.load %arg2[%c0_10] : memref<1xf32, #tpu.memory_space<smem>>
    %25 = vector.broadcast %24 : f32 to vector<1x2048xf32>
    %26 = arith.addf %23, %25 : vector<1x2048xf32>
    %c0_11 = arith.constant 0 : index
    %c0_12 = arith.constant 0 : index
    %27 = vector.load %arg4[%c0_11, %c0_12] : memref<1x2048xf32, #tpu.memory_space<vmem>>, vector<1x2048xf32>
    tpu.vector_store %arg4[%c0_11, %c0_12], %26 {strides = array<i32>} : memref<1x2048xf32, #tpu.memory_space<vmem>>, vector<1x2048xf32>,
    return
  }
  func.func @transform_0(%arg0: i32) -> i32 {
    %c0_i32 = arith.constant 0 : i32
    %c0_i32_0 = arith.constant 0 : i32
    return %c0_i32 : i32
  }
  func.func @transform_1(%arg0: i32) -> i32 {
    %c0_i32 = arith.constant 0 : i32
    %c0_i32_0 = arith.constant 0 : i32
    return %c0_i32 : i32
  }
  func.func @transform_2(%arg0: i32) -> (i32, i32) {
    %c0_i32 = arith.constant 0 : i32
    %c0_i32_0 = arith.constant 0 : i32
    return %c0_i32, %arg0 : i32, i32
  }
  func.func @transform_3(%arg0: i32) -> (i32, i32) {
    %c0_i32 = arith.constant 0 : i32
    %c0_i32_0 = arith.constant 0 : i32
    return %c0_i32, %arg0 : i32, i32
  }
}

</mosaic_0001>

<bundles_post_ra>
// kernel: linear_forward.1
= control target key start
LH: loop header
LB: loop body
LE: loop exit
PB: predicated region body
PF: predicated region fallthrough
CT: control target
= control target key end

     0   :  { %9 = vsyncpa [#allocation4], 0  ;;  %s251_s0 = inlined_call_operand.vmem [shape: f32[5], index: 0, kind: input, shape index: {}]   ;;  %s252_s1 = inlined_call_operand.<no memory space> [shape: f32[1], index: 1, kind: input, shape index: {}]   ;;  %s253_s2 = inlined_call_operand.vmem [shape: f32[5,2048], index: 2, kind: input, shape index: {}]   ;;  %s254_s3 = inlined_call_operand.vmem [shape: f32[1,2048], index: 3, kind: output, shape index: {}]  }
   0x1   :  { %s16_s14 = sshll.u32 %s251_s0, 4  ;;  %s17_s14 = int_to_ptr.vmem [resolvable:$true] %s16_s14 }
   0x2   :  { %s129_s15 = scalar_lea.vmem %s17_s14, 16  ;;  %p134_p1 = scmp.lt.s32.totalorder %s17_s14, %s17_s14 }
   0x3   :  { %p130_p0 = scmp.ne.s32.totalorder %s17_s14, %s129_s15  ;;  %p135_p2 = scmp.lt.s32.totalorder %s129_s15, %s129_s15 }
   0x5   :  { %p136_p3 = por %p135_p2, %p134_p1 }
   0x7   :  { %p137_p4 = pnand %p136_p3, %p130_p0 }
   0x9   :  { %140 = shalt.err (!%p137_p4)
}
   0xa   :  { %s143_s16 = smov [#allocation3]  }
   0xb   :  { %19 = dma.vmem_to_smem %s17_s14, 16, %s143_s16, [#allocation4]  }
   0xc   :  { %141 = dma.done.wait [#allocation4], 16  }
   0xd   :  { %142 = vsyncadd [#allocation4], 4294967280 }
   0xe   :  { %27 = sfence }
   0xf   :  { %v28_v0 = vld [vmem:[%s253_s2] ss:$8 sm:$0xf]  ;;  %s173_s0 = sld [smem:[#allocation3]]  ;;  %s181_s25 = sld [smem:[#allocation3 + $0x1]]  ;;  %v96_v48 = vstv %s252_s1 }
  0x10   :  { %v29_v1 = vld [vmem:[%s253_s2] ss:$8 sm:$0xf0]  ;;  %v108_v2 = vld [vmem:[%s253_s2 + $0x1] ss:$8 sm:$0xf] }
  0x11   :  { %v109_v3 = vld [vmem:[%s253_s2 + $0x1] ss:$8 sm:$0xf0]  ;;  %v113_v4 = vld [vmem:[%s253_s2 + $0x2] ss:$8 sm:$0xf]  ;;  %v30_v6 = vor.u32 %v29_v1, %v28_v0 }
  0x12   :  { %v114_v5 = vld [vmem:[%s253_s2 + $0x2] ss:$8 sm:$0xf0]  ;;  %s189_s30 = sld [smem:[#allocation3 + $0x2]]  ;;  %v42_v8 = vor.u32 %v109_v3, %v108_v2  ;;  %s197_s8 = sld [smem:[#allocation3 + $0x3]] }
  0x13   :  { %v118_v7 = vld [vmem:[%s253_s2 + $0x3] ss:$8 sm:$0xf]  ;;  %v123_v10 = vld [vmem:[%s253_s2 + $0x4] ss:$8 sm:$0xf]  ;;  %v56_v13 = vor.u32 %v114_v5, %v113_v4 }
  0x14   :  { %v119_v9 = vld [vmem:[%s253_s2 + $0x3] ss:$8 sm:$0xf0]  ;;  %v124_v11 = vld [vmem:[%s253_s2 + $0x4] ss:$8 sm:$0xf0] }
  0x15   :  { %v36_v12 = vstv %s173_s0  ;;  %s206_s13 = sld [smem:[#allocation3 + $0x4]]  ;;  %v106_v14 = vld [vmem:[%s253_s2 + $0x40] ss:$8 sm:$0xf]  ;;  %v48_v16 = vstv %s181_s25  ;;  %v70_v17 = vor.u32 %v119_v9, %v118_v7  ;;  %v84_v25 = vor.u32 %v124_v11, %v123_v10 }
  0x16   :  { %v37_v15 = vmul.f32 %v36_v12, %v30_v6  ;;  %v107_v18 = vld [vmem:[%s253_s2 + $0x40] ss:$8 sm:$0xf0]  ;;  %v110_v19 = vld [vmem:[%s253_s2 + $0x41] ss:$8 sm:$0xf]  ;;  %v49_v20 = vmul.f32 %v48_v16, %v42_v8 }
  0x17   :  { %v34_v21 = vor.u32 %v107_v18, %v106_v14  ;;  %v111_v22 = vld [vmem:[%s253_s2 + $0x41] ss:$8 sm:$0xf0]  ;;  %v115_v23 = vld [vmem:[%s253_s2 + $0x42] ss:$8 sm:$0xf] }
  0x18   :  { %v62_v24 = vstv %s189_s30  ;;  %v46_v26 = vor.u32 %v111_v22, %v110_v19  ;;  %v116_v27 = vld [vmem:[%s253_s2 + $0x42] ss:$8 sm:$0xf0]  ;;  %v120_v28 = vld [vmem:[%s253_s2 + $0x43] ss:$8 sm:$0xf]  ;;  %v51_v29 = vadd.f32 %v49_v20, %v37_v15  ;;  %v76_v31 = vstv %s197_s8 }
  0x19   :  { %v63_v30 = vmul.f32 %v62_v24, %v56_v13  ;;  %v38_v32 = vmul.f32 %v36_v12, %v34_v21  ;;  %v121_v33 = vld [vmem:[%s253_s2 + $0x43] ss:$8 sm:$0xf0]  ;;  %v125_v34 = vld [vmem:[%s253_s2 + $0x44] ss:$8 sm:$0xf]  ;;  %v77_v35 = vmul.f32 %v76_v31, %v70_v17  ;;  %v60_v37 = vor.u32 %v116_v27, %v115_v23 }
  0x1a   :  { %v50_v36 = vmul.f32 %v48_v16, %v46_v26  ;;  %v74_v38 = vor.u32 %v121_v33, %v120_v28  ;;  %v126_v39 = vld [vmem:[%s253_s2 + $0x44] ss:$8 sm:$0xf0] }
  0x1b   :  { %v65_v40 = vadd.f32 %v63_v30, %v51_v29  ;;  %v90_v41 = vstv %s206_s13  ;;  %v88_v42 = vor.u32 %v126_v39, %v125_v34  ;;  %v64_v45 = vmul.f32 %v62_v24, %v60_v37 }
  0x1c   :  { %v91_v43 = vmul.f32 %v90_v41, %v84_v25  ;;  %v52_v44 = vadd.f32 %v50_v36, %v38_v32  ;;  %v78_v46 = vmul.f32 %v76_v31, %v74_v38 }
  0x1d   :  { %v79_v47 = vadd.f32 %v77_v35, %v65_v40  ;;  %v92_v50 = vmul.f32 %v90_v41, %v88_v42 }
  0x1e   :  { %v66_v49 = vadd.f32 %v64_v45, %v52_v44 }
  0x1f   :  { %v93_v51 = vadd.f32 %v91_v43, %v79_v47 }
  0x20   :  { %v80_v52 = vadd.f32 %v78_v46, %v66_v49 }
  0x21   :  { %v97_v53 = vadd.f32 %v96_v48, %v93_v51 }
  0x22   :  { %v94_v54 = vadd.f32 %v92_v50, %v80_v52 }
  0x23   :  { %99 = vst [vmem:[%s254_s3] sm:$0xff] %v97_v53 }
  0x24   :  { %v98_v55 = vadd.f32 %v96_v48, %v94_v54 }
  0x26   :  { %100 = vst [vmem:[%s254_s3 + $0x8] sm:$0xff] %v98_v55 }
  0x27   :  { %105 = vsyncpa [#allocation4], 1 }

</bundles_post_ra>
